<compile_context>
chip_gen: v7x
topology: tpu7x:2x2x1
jax: 0.10.0
libtpu: 0.0.40
codegen_flags: <defaults>
</compile_context>

<pallas_src>
import jax
import jax.numpy as jnp
from jax.experimental import pallas as pl
from jax.experimental.pallas import tpu as pltpu


def _make_gather_kernel(tokens_per_block):
    T = tokens_per_block

    def embedding_gather_kernel(idx_ref, table_hbm, out_ref, sems):
        # idx_ref   : (N_pad,) int32 token ids, SMEM (scalar prefetch)
        # table_hbm : (V, D) float table, left in HBM (pl.ANY)
        # out_ref   : (T, D) VMEM output tile for this token block
        # sems      : (T,) DMA completion semaphores
        blk = pl.program_id(0)
        base = blk * T

        # Issue all T row copies first (depth-T pipeline), then wait.
        copies = []
        for t in range(T):  # static unroll, T is small
            row = idx_ref[base + t]
            cp = pltpu.make_async_copy(
                table_hbm.at[pl.ds(row, 1), :],   # (1, D) row in HBM
                out_ref.at[pl.ds(t, 1), :],       # (1, D) row in VMEM
                sems.at[t],
            )
            cp.start()
            copies.append(cp)
        for cp in copies:
            cp.wait()

    return embedding_gather_kernel


def lookup_encoder(indices, table, tokens_per_block=8):
    """indices: (B, S) int ; table: (V, D) float -> (B, S, D) float."""
    B, S = indices.shape
    V, D = table.shape
    N = B * S

    T = min(tokens_per_block, N)
    n_blocks = -(-N // T)          # ceil-div
    N_pad = n_blocks * T

    flat_idx = indices.reshape(-1).astype(jnp.int32)
    if N_pad > N:
        # Pad with a valid row id (0); padded rows are sliced off below.
        flat_idx = jnp.concatenate(
            [flat_idx, jnp.zeros((N_pad - N,), jnp.int32)]
        )

    out = pl.pallas_call(
        _make_gather_kernel(T),
        out_shape=jax.ShapeDtypeStruct((N_pad, D), table.dtype),
        grid_spec=pltpu.PrefetchScalarGridSpec(
            num_scalar_prefetch=1,                       # flat_idx -> SMEM
            grid=(n_blocks,),
            in_specs=[
                pl.BlockSpec(memory_space=pl.ANY),       # table stays in HBM
            ],
            out_specs=pl.BlockSpec((T, D), lambda i, ids: (i, 0)),
            scratch_shapes=[pltpu.SemaphoreType.DMA((T,))],
        ),
        compiler_params=pltpu.CompilerParams(
            dimension_semantics=("parallel",),           # megacore on v7x
        ),
    )(flat_idx, table)

    return out[:N].reshape(B, S, D)


if __name__ == "__main__":
    # Small, module-consistent shapes.
    vocab_size = 256
    embedding_dim = 128
    B, S = 2, 8

    key = jax.random.PRNGKey(0)
    k_table, k_idx = jax.random.split(key)

    # nn.Embedding default init ~ N(0, 1); deterministic synthetic weights.
    word_embeddings = jax.random.normal(
        k_table, (vocab_size, embedding_dim), dtype=jnp.float32
    )
    batch = jax.random.randint(k_idx, (B, S), 0, vocab_size, dtype=jnp.int32)

    out = lookup_encoder(batch, word_embeddings)
    out = jax.block_until_ready(out)

    # Sanity-check against the plain-JAX reference gather (DMA gather is bit-exact).
    ref = jnp.take(word_embeddings, batch, axis=0)
    assert out.shape == (B, S, embedding_dim)
    assert jnp.array_equal(out, ref), "mismatch vs reference gather"

    # TODO(synk): torch.nn.Embedding raises on out-of-range ids and supports
    # padding_idx; this kernel assumes all ids are in [0, vocab_size).

    print("KERNEL_OK")
</pallas_src>

<mosaic_0001>
module attributes {stable_mosaic.version = 11 : i64} {
  func.func @embedding_gather_kernel(%arg0: i32, %arg1: memref<16xi32, #tpu.memory_space<smem>>, %arg2: memref<256x128xf32, #tpu.memory_space<any>>, %arg3: memref<8x128xf32, #tpu.memory_space<vmem>>, %arg4: memref<8x!tpu.dma_semaphore, #tpu.memory_space<semaphore_mem>>) attributes {dimension_semantics = [#tpu.dimension_semantics<parallel>], iteration_bounds = array<i64: 2>, scalar_prefetch = 1 : i64, scratch_operands = 1 : i64, tpu.core_type = #tpu.core_type<tc>, window_params = [{}, {transform_indices = @transform_1, window_bounds = array<i64: 8, 128>}]} {
    %c8_i32 = arith.constant 8 : i32
    %0 = arith.muli %arg0, %c8_i32 : i32
    %c0_i32 = arith.constant 0 : i32
    %1 = arith.addi %0, %c0_i32 : i32
    %2 = arith.index_cast %1 : i32 to index
    %3 = memref.load %arg1[%2] : memref<16xi32, #tpu.memory_space<smem>>
    %c0_i32_0 = arith.constant 0 : i32
    %c0_i32_1 = arith.constant 0 : i32
    %4 = tpu.memref_slice %arg2[%3, %c0_i32_1] : memref<256x128xf32, #tpu.memory_space<any>> -> memref<1x128xf32, #tpu.memory_space<any>>
    %c0_i32_2 = arith.constant 0 : i32
    %c0_i32_3 = arith.constant 0 : i32
    %5 = tpu.memref_slice %arg3[%c0_i32_2, %c0_i32_3] : memref<8x128xf32, #tpu.memory_space<vmem>> -> memref<1x128xf32, #tpu.memory_space<vmem>>
    %6 = tpu.memref_slice %arg4[%c0_i32_0] : memref<8x!tpu.dma_semaphore, #tpu.memory_space<semaphore_mem>> -> memref<1x!tpu.dma_semaphore, #tpu.memory_space<semaphore_mem>>
    %7 = tpu.memref_squeeze %6 : memref<1x!tpu.dma_semaphore, #tpu.memory_space<semaphore_mem>> -> memref<!tpu.dma_semaphore, #tpu.memory_space<semaphore_mem>>
    tpu.enqueue_dma source(%4 : memref<1x128xf32, #tpu.memory_space<any>>) target(%5 : memref<1x128xf32, #tpu.memory_space<vmem>>) target_semaphore(%7 : memref<!tpu.dma_semaphore, #tpu.memory_space<semaphore_mem>>)
    %c1_i32 = arith.constant 1 : i32
    %8 = arith.addi %0, %c1_i32 : i32
    %9 = arith.index_cast %8 : i32 to index
    %10 = memref.load %arg1[%9] : memref<16xi32, #tpu.memory_space<smem>>
    %c1_i32_4 = arith.constant 1 : i32
    %c0_i32_5 = arith.constant 0 : i32
    %11 = tpu.memref_slice %arg2[%10, %c0_i32_5] : memref<256x128xf32, #tpu.memory_space<any>> -> memref<1x128xf32, #tpu.memory_space<any>>
    %c1_i32_6 = arith.constant 1 : i32
    %c0_i32_7 = arith.constant 0 : i32
    %12 = tpu.memref_slice %arg3[%c1_i32_6, %c0_i32_7] : memref<8x128xf32, #tpu.memory_space<vmem>> -> memref<1x128xf32, #tpu.memory_space<vmem>>
    %13 = tpu.memref_slice %arg4[%c1_i32_4] : memref<8x!tpu.dma_semaphore, #tpu.memory_space<semaphore_mem>> -> memref<1x!tpu.dma_semaphore, #tpu.memory_space<semaphore_mem>>
    %14 = tpu.memref_squeeze %13 : memref<1x!tpu.dma_semaphore, #tpu.memory_space<semaphore_mem>> -> memref<!tpu.dma_semaphore, #tpu.memory_space<semaphore_mem>>
    tpu.enqueue_dma source(%11 : memref<1x128xf32, #tpu.memory_space<any>>) target(%12 : memref<1x128xf32, #tpu.memory_space<vmem>>) target_semaphore(%14 : memref<!tpu.dma_semaphore, #tpu.memory_space<semaphore_mem>>)
    %c2_i32 = arith.constant 2 : i32
    %15 = arith.addi %0, %c2_i32 : i32
    %16 = arith.index_cast %15 : i32 to index
    %17 = memref.load %arg1[%16] : memref<16xi32, #tpu.memory_space<smem>>
    %c2_i32_8 = arith.constant 2 : i32
    %c0_i32_9 = arith.constant 0 : i32
    %18 = tpu.memref_slice %arg2[%17, %c0_i32_9] : memref<256x128xf32, #tpu.memory_space<any>> -> memref<1x128xf32, #tpu.memory_space<any>>
    %c2_i32_10 = arith.constant 2 : i32
    %c0_i32_11 = arith.constant 0 : i32
    %19 = tpu.memref_slice %arg3[%c2_i32_10, %c0_i32_11] : memref<8x128xf32, #tpu.memory_space<vmem>> -> memref<1x128xf32, #tpu.memory_space<vmem>>
    %20 = tpu.memref_slice %arg4[%c2_i32_8] : memref<8x!tpu.dma_semaphore, #tpu.memory_space<semaphore_mem>> -> memref<1x!tpu.dma_semaphore, #tpu.memory_space<semaphore_mem>>
    %21 = tpu.memref_squeeze %20 : memref<1x!tpu.dma_semaphore, #tpu.memory_space<semaphore_mem>> -> memref<!tpu.dma_semaphore, #tpu.memory_space<semaphore_mem>>
    tpu.enqueue_dma source(%18 : memref<1x128xf32, #tpu.memory_space<any>>) target(%19 : memref<1x128xf32, #tpu.memory_space<vmem>>) target_semaphore(%21 : memref<!tpu.dma_semaphore, #tpu.memory_space<semaphore_mem>>)
    %c3_i32 = arith.constant 3 : i32
    %22 = arith.addi %0, %c3_i32 : i32
    %23 = arith.index_cast %22 : i32 to index
    %24 = memref.load %arg1[%23] : memref<16xi32, #tpu.memory_space<smem>>
    %c3_i32_12 = arith.constant 3 : i32
    %c0_i32_13 = arith.constant 0 : i32
    %25 = tpu.memref_slice %arg2[%24, %c0_i32_13] : memref<256x128xf32, #tpu.memory_space<any>> -> memref<1x128xf32, #tpu.memory_space<any>>
    %c3_i32_14 = arith.constant 3 : i32
    %c0_i32_15 = arith.constant 0 : i32
    %26 = tpu.memref_slice %arg3[%c3_i32_14, %c0_i32_15] : memref<8x128xf32, #tpu.memory_space<vmem>> -> memref<1x128xf32, #tpu.memory_space<vmem>>
    %27 = tpu.memref_slice %arg4[%c3_i32_12] : memref<8x!tpu.dma_semaphore, #tpu.memory_space<semaphore_mem>> -> memref<1x!tpu.dma_semaphore, #tpu.memory_space<semaphore_mem>>
    %28 = tpu.memref_squeeze %27 : memref<1x!tpu.dma_semaphore, #tpu.memory_space<semaphore_mem>> -> memref<!tpu.dma_semaphore, #tpu.memory_space<semaphore_mem>>
    tpu.enqueue_dma source(%25 : memref<1x128xf32, #tpu.memory_space<any>>) target(%26 : memref<1x128xf32, #tpu.memory_space<vmem>>) target_semaphore(%28 : memref<!tpu.dma_semaphore, #tpu.memory_space<semaphore_mem>>)
    %c4_i32 = arith.constant 4 : i32
    %29 = arith.addi %0, %c4_i32 : i32
    %30 = arith.index_cast %29 : i32 to index
    %31 = memref.load %arg1[%30] : memref<16xi32, #tpu.memory_space<smem>>
    %c4_i32_16 = arith.constant 4 : i32
    %c0_i32_17 = arith.constant 0 : i32
    %32 = tpu.memref_slice %arg2[%31, %c0_i32_17] : memref<256x128xf32, #tpu.memory_space<any>> -> memref<1x128xf32, #tpu.memory_space<any>>
    %c4_i32_18 = arith.constant 4 : i32
    %c0_i32_19 = arith.constant 0 : i32
    %33 = tpu.memref_slice %arg3[%c4_i32_18, %c0_i32_19] : memref<8x128xf32, #tpu.memory_space<vmem>> -> memref<1x128xf32, #tpu.memory_space<vmem>>
    %34 = tpu.memref_slice %arg4[%c4_i32_16] : memref<8x!tpu.dma_semaphore, #tpu.memory_space<semaphore_mem>> -> memref<1x!tpu.dma_semaphore, #tpu.memory_space<semaphore_mem>>
    %35 = tpu.memref_squeeze %34 : memref<1x!tpu.dma_semaphore, #tpu.memory_space<semaphore_mem>> -> memref<!tpu.dma_semaphore, #tpu.memory_space<semaphore_mem>>
    tpu.enqueue_dma source(%32 : memref<1x128xf32, #tpu.memory_space<any>>) target(%33 : memref<1x128xf32, #tpu.memory_space<vmem>>) target_semaphore(%35 : memref<!tpu.dma_semaphore, #tpu.memory_space<semaphore_mem>>)
    %c5_i32 = arith.constant 5 : i32
    %36 = arith.addi %0, %c5_i32 : i32
    %37 = arith.index_cast %36 : i32 to index
    %38 = memref.load %arg1[%37] : memref<16xi32, #tpu.memory_space<smem>>
    %c5_i32_20 = arith.constant 5 : i32
    %c0_i32_21 = arith.constant 0 : i32
    %39 = tpu.memref_slice %arg2[%38, %c0_i32_21] : memref<256x128xf32, #tpu.memory_space<any>> -> memref<1x128xf32, #tpu.memory_space<any>>
    %c5_i32_22 = arith.constant 5 : i32
    %c0_i32_23 = arith.constant 0 : i32
    %40 = tpu.memref_slice %arg3[%c5_i32_22, %c0_i32_23] : memref<8x128xf32, #tpu.memory_space<vmem>> -> memref<1x128xf32, #tpu.memory_space<vmem>>
    %41 = tpu.memref_slice %arg4[%c5_i32_20] : memref<8x!tpu.dma_semaphore, #tpu.memory_space<semaphore_mem>> -> memref<1x!tpu.dma_semaphore, #tpu.memory_space<semaphore_mem>>
    %42 = tpu.memref_squeeze %41 : memref<1x!tpu.dma_semaphore, #tpu.memory_space<semaphore_mem>> -> memref<!tpu.dma_semaphore, #tpu.memory_space<semaphore_mem>>
    tpu.enqueue_dma source(%39 : memref<1x128xf32, #tpu.memory_space<any>>) target(%40 : memref<1x128xf32, #tpu.memory_space<vmem>>) target_semaphore(%42 : memref<!tpu.dma_semaphore, #tpu.memory_space<semaphore_mem>>)
    %c6_i32 = arith.constant 6 : i32
    %43 = arith.addi %0, %c6_i32 : i32
    %44 = arith.index_cast %43 : i32 to index
    %45 = memref.load %arg1[%44] : memref<16xi32, #tpu.memory_space<smem>>
    %c6_i32_24 = arith.constant 6 : i32
    %c0_i32_25 = arith.constant 0 : i32
    %46 = tpu.memref_slice %arg2[%45, %c0_i32_25] : memref<256x128xf32, #tpu.memory_space<any>> -> memref<1x128xf32, #tpu.memory_space<any>>
    %c6_i32_26 = arith.constant 6 : i32
    %c0_i32_27 = arith.constant 0 : i32
    %47 = tpu.memref_slice %arg3[%c6_i32_26, %c0_i32_27] : memref<8x128xf32, #tpu.memory_space<vmem>> -> memref<1x128xf32, #tpu.memory_space<vmem>>
    %48 = tpu.memref_slice %arg4[%c6_i32_24] : memref<8x!tpu.dma_semaphore, #tpu.memory_space<semaphore_mem>> -> memref<1x!tpu.dma_semaphore, #tpu.memory_space<semaphore_mem>>
    %49 = tpu.memref_squeeze %48 : memref<1x!tpu.dma_semaphore, #tpu.memory_space<semaphore_mem>> -> memref<!tpu.dma_semaphore, #tpu.memory_space<semaphore_mem>>
    tpu.enqueue_dma source(%46 : memref<1x128xf32, #tpu.memory_space<any>>) target(%47 : memref<1x128xf32, #tpu.memory_space<vmem>>) target_semaphore(%49 : memref<!tpu.dma_semaphore, #tpu.memory_space<semaphore_mem>>)
    %c7_i32 = arith.constant 7 : i32
    %50 = arith.addi %0, %c7_i32 : i32
    %51 = arith.index_cast %50 : i32 to index
    %52 = memref.load %arg1[%51] : memref<16xi32, #tpu.memory_space<smem>>
    %c7_i32_28 = arith.constant 7 : i32
    %c0_i32_29 = arith.constant 0 : i32
    %53 = tpu.memref_slice %arg2[%52, %c0_i32_29] : memref<256x128xf32, #tpu.memory_space<any>> -> memref<1x128xf32, #tpu.memory_space<any>>
    %c7_i32_30 = arith.constant 7 : i32
    %c0_i32_31 = arith.constant 0 : i32
    %54 = tpu.memref_slice %arg3[%c7_i32_30, %c0_i32_31] : memref<8x128xf32, #tpu.memory_space<vmem>> -> memref<1x128xf32, #tpu.memory_space<vmem>>
    %55 = tpu.memref_slice %arg4[%c7_i32_28] : memref<8x!tpu.dma_semaphore, #tpu.memory_space<semaphore_mem>> -> memref<1x!tpu.dma_semaphore, #tpu.memory_space<semaphore_mem>>
    %56 = tpu.memref_squeeze %55 : memref<1x!tpu.dma_semaphore, #tpu.memory_space<semaphore_mem>> -> memref<!tpu.dma_semaphore, #tpu.memory_space<semaphore_mem>>
    tpu.enqueue_dma source(%53 : memref<1x128xf32, #tpu.memory_space<any>>) target(%54 : memref<1x128xf32, #tpu.memory_space<vmem>>) target_semaphore(%56 : memref<!tpu.dma_semaphore, #tpu.memory_space<semaphore_mem>>)
    %c0_i32_32 = arith.constant 0 : i32
    %c0_i32_33 = arith.constant 0 : i32
    %57 = tpu.memref_slice %arg2[%3, %c0_i32_33] : memref<256x128xf32, #tpu.memory_space<any>> -> memref<1x128xf32, #tpu.memory_space<any>>
    %c0_i32_34 = arith.constant 0 : i32
    %c0_i32_35 = arith.constant 0 : i32
    %58 = tpu.memref_slice %arg3[%c0_i32_34, %c0_i32_35] : memref<8x128xf32, #tpu.memory_space<vmem>> -> memref<1x128xf32, #tpu.memory_space<vmem>>
    %59 = tpu.memref_slice %arg4[%c0_i32_32] : memref<8x!tpu.dma_semaphore, #tpu.memory_space<semaphore_mem>> -> memref<1x!tpu.dma_semaphore, #tpu.memory_space<semaphore_mem>>
    %60 = tpu.memref_squeeze %59 : memref<1x!tpu.dma_semaphore, #tpu.memory_space<semaphore_mem>> -> memref<!tpu.dma_semaphore, #tpu.memory_space<semaphore_mem>>
    tpu.wait_dma2 semaphore(%60 : memref<!tpu.dma_semaphore, #tpu.memory_space<semaphore_mem>>) src(%57 : memref<1x128xf32, #tpu.memory_space<any>>) dst(%58 : memref<1x128xf32, #tpu.memory_space<vmem>>)
    %c1_i32_36 = arith.constant 1 : i32
    %c0_i32_37 = arith.constant 0 : i32
    %61 = tpu.memref_slice %arg2[%10, %c0_i32_37] : memref<256x128xf32, #tpu.memory_space<any>> -> memref<1x128xf32, #tpu.memory_space<any>>
    %c1_i32_38 = arith.constant 1 : i32
    %c0_i32_39 = arith.constant 0 : i32
    %62 = tpu.memref_slice %arg3[%c1_i32_38, %c0_i32_39] : memref<8x128xf32, #tpu.memory_space<vmem>> -> memref<1x128xf32, #tpu.memory_space<vmem>>
    %63 = tpu.memref_slice %arg4[%c1_i32_36] : memref<8x!tpu.dma_semaphore, #tpu.memory_space<semaphore_mem>> -> memref<1x!tpu.dma_semaphore, #tpu.memory_space<semaphore_mem>>
    %64 = tpu.memref_squeeze %63 : memref<1x!tpu.dma_semaphore, #tpu.memory_space<semaphore_mem>> -> memref<!tpu.dma_semaphore, #tpu.memory_space<semaphore_mem>>
    tpu.wait_dma2 semaphore(%64 : memref<!tpu.dma_semaphore, #tpu.memory_space<semaphore_mem>>) src(%61 : memref<1x128xf32, #tpu.memory_space<any>>) dst(%62 : memref<1x128xf32, #tpu.memory_space<vmem>>)
    %c2_i32_40 = arith.constant 2 : i32
    %c0_i32_41 = arith.constant 0 : i32
    %65 = tpu.memref_slice %arg2[%17, %c0_i32_41] : memref<256x128xf32, #tpu.memory_space<any>> -> memref<1x128xf32, #tpu.memory_space<any>>
    %c2_i32_42 = arith.constant 2 : i32
    %c0_i32_43 = arith.constant 0 : i32
    %66 = tpu.memref_slice %arg3[%c2_i32_42, %c0_i32_43] : memref<8x128xf32, #tpu.memory_space<vmem>> -> memref<1x128xf32, #tpu.memory_space<vmem>>
    %67 = tpu.memref_slice %arg4[%c2_i32_40] : memref<8x!tpu.dma_semaphore, #tpu.memory_space<semaphore_mem>> -> memref<1x!tpu.dma_semaphore, #tpu.memory_space<semaphore_mem>>
    %68 = tpu.memref_squeeze %67 : memref<1x!tpu.dma_semaphore, #tpu.memory_space<semaphore_mem>> -> memref<!tpu.dma_semaphore, #tpu.memory_space<semaphore_mem>>
    tpu.wait_dma2 semaphore(%68 : memref<!tpu.dma_semaphore, #tpu.memory_space<semaphore_mem>>) src(%65 : memref<1x128xf32, #tpu.memory_space<any>>) dst(%66 : memref<1x128xf32, #tpu.memory_space<vmem>>)
    %c3_i32_44 = arith.constant 3 : i32
    %c0_i32_45 = arith.constant 0 : i32
    %69 = tpu.memref_slice %arg2[%24, %c0_i32_45] : memref<256x128xf32, #tpu.memory_space<any>> -> memref<1x128xf32, #tpu.memory_space<any>>
    %c3_i32_46 = arith.constant 3 : i32
    %c0_i32_47 = arith.constant 0 : i32
    %70 = tpu.memref_slice %arg3[%c3_i32_46, %c0_i32_47] : memref<8x128xf32, #tpu.memory_space<vmem>> -> memref<1x128xf32, #tpu.memory_space<vmem>>
    %71 = tpu.memref_slice %arg4[%c3_i32_44] : memref<8x!tpu.dma_semaphore, #tpu.memory_space<semaphore_mem>> -> memref<1x!tpu.dma_semaphore, #tpu.memory_space<semaphore_mem>>
    %72 = tpu.memref_squeeze %71 : memref<1x!tpu.dma_semaphore, #tpu.memory_space<semaphore_mem>> -> memref<!tpu.dma_semaphore, #tpu.memory_space<semaphore_mem>>
    tpu.wait_dma2 semaphore(%72 : memref<!tpu.dma_semaphore, #tpu.memory_space<semaphore_mem>>) src(%69 : memref<1x128xf32, #tpu.memory_space<any>>) dst(%70 : memref<1x128xf32, #tpu.memory_space<vmem>>)
    %c4_i32_48 = arith.constant 4 : i32
    %c0_i32_49 = arith.constant 0 : i32
    %73 = tpu.memref_slice %arg2[%31, %c0_i32_49] : memref<256x128xf32, #tpu.memory_space<any>> -> memref<1x128xf32, #tpu.memory_space<any>>
    %c4_i32_50 = arith.constant 4 : i32
    %c0_i32_51 = arith.constant 0 : i32
    %74 = tpu.memref_slice %arg3[%c4_i32_50, %c0_i32_51] : memref<8x128xf32, #tpu.memory_space<vmem>> -> memref<1x128xf32, #tpu.memory_space<vmem>>
    %75 = tpu.memref_slice %arg4[%c4_i32_48] : memref<8x!tpu.dma_semaphore, #tpu.memory_space<semaphore_mem>> -> memref<1x!tpu.dma_semaphore, #tpu.memory_space<semaphore_mem>>
    %76 = tpu.memref_squeeze %75 : memref<1x!tpu.dma_semaphore, #tpu.memory_space<semaphore_mem>> -> memref<!tpu.dma_semaphore, #tpu.memory_space<semaphore_mem>>
    tpu.wait_dma2 semaphore(%76 : memref<!tpu.dma_semaphore, #tpu.memory_space<semaphore_mem>>) src(%73 : memref<1x128xf32, #tpu.memory_space<any>>) dst(%74 : memref<1x128xf32, #tpu.memory_space<vmem>>)
    %c5_i32_52 = arith.constant 5 : i32
    %c0_i32_53 = arith.constant 0 : i32
    %77 = tpu.memref_slice %arg2[%38, %c0_i32_53] : memref<256x128xf32, #tpu.memory_space<any>> -> memref<1x128xf32, #tpu.memory_space<any>>
    %c5_i32_54 = arith.constant 5 : i32
    %c0_i32_55 = arith.constant 0 : i32
    %78 = tpu.memref_slice %arg3[%c5_i32_54, %c0_i32_55] : memref<8x128xf32, #tpu.memory_space<vmem>> -> memref<1x128xf32, #tpu.memory_space<vmem>>
    %79 = tpu.memref_slice %arg4[%c5_i32_52] : memref<8x!tpu.dma_semaphore, #tpu.memory_space<semaphore_mem>> -> memref<1x!tpu.dma_semaphore, #tpu.memory_space<semaphore_mem>>
    %80 = tpu.memref_squeeze %79 : memref<1x!tpu.dma_semaphore, #tpu.memory_space<semaphore_mem>> -> memref<!tpu.dma_semaphore, #tpu.memory_space<semaphore_mem>>
    tpu.wait_dma2 semaphore(%80 : memref<!tpu.dma_semaphore, #tpu.memory_space<semaphore_mem>>) src(%77 : memref<1x128xf32, #tpu.memory_space<any>>) dst(%78 : memref<1x128xf32, #tpu.memory_space<vmem>>)
    %c6_i32_56 = arith.constant 6 : i32
    %c0_i32_57 = arith.constant 0 : i32
    %81 = tpu.memref_slice %arg2[%45, %c0_i32_57] : memref<256x128xf32, #tpu.memory_space<any>> -> memref<1x128xf32, #tpu.memory_space<any>>
    %c6_i32_58 = arith.constant 6 : i32
    %c0_i32_59 = arith.constant 0 : i32
    %82 = tpu.memref_slice %arg3[%c6_i32_58, %c0_i32_59] : memref<8x128xf32, #tpu.memory_space<vmem>> -> memref<1x128xf32, #tpu.memory_space<vmem>>
    %83 = tpu.memref_slice %arg4[%c6_i32_56] : memref<8x!tpu.dma_semaphore, #tpu.memory_space<semaphore_mem>> -> memref<1x!tpu.dma_semaphore, #tpu.memory_space<semaphore_mem>>
    %84 = tpu.memref_squeeze %83 : memref<1x!tpu.dma_semaphore, #tpu.memory_space<semaphore_mem>> -> memref<!tpu.dma_semaphore, #tpu.memory_space<semaphore_mem>>
    tpu.wait_dma2 semaphore(%84 : memref<!tpu.dma_semaphore, #tpu.memory_space<semaphore_mem>>) src(%81 : memref<1x128xf32, #tpu.memory_space<any>>) dst(%82 : memref<1x128xf32, #tpu.memory_space<vmem>>)
    %c7_i32_60 = arith.constant 7 : i32
    %c0_i32_61 = arith.constant 0 : i32
    %85 = tpu.memref_slice %arg2[%52, %c0_i32_61] : memref<256x128xf32, #tpu.memory_space<any>> -> memref<1x128xf32, #tpu.memory_space<any>>
    %c7_i32_62 = arith.constant 7 : i32
    %c0_i32_63 = arith.constant 0 : i32
    %86 = tpu.memref_slice %arg3[%c7_i32_62, %c0_i32_63] : memref<8x128xf32, #tpu.memory_space<vmem>> -> memref<1x128xf32, #tpu.memory_space<vmem>>
    %87 = tpu.memref_slice %arg4[%c7_i32_60] : memref<8x!tpu.dma_semaphore, #tpu.memory_space<semaphore_mem>> -> memref<1x!tpu.dma_semaphore, #tpu.memory_space<semaphore_mem>>
    %88 = tpu.memref_squeeze %87 : memref<1x!tpu.dma_semaphore, #tpu.memory_space<semaphore_mem>> -> memref<!tpu.dma_semaphore, #tpu.memory_space<semaphore_mem>>
    tpu.wait_dma2 semaphore(%88 : memref<!tpu.dma_semaphore, #tpu.memory_space<semaphore_mem>>) src(%85 : memref<1x128xf32, #tpu.memory_space<any>>) dst(%86 : memref<1x128xf32, #tpu.memory_space<vmem>>)
    return
  }
  func.func @transform_1(%arg0: i32, %arg1: memref<16xi32, #tpu.memory_space<smem>>) -> (i32, i32) {
    %c0_i32 = arith.constant 0 : i32
    %c0_i32_0 = arith.constant 0 : i32
    return %arg0, %c0_i32 : i32, i32
  }
}

</mosaic_0001>

<bundles_post_ra>
// kernel: tpu_custom_call.1
= control target key start
LH: loop header
LB: loop body
LE: loop exit
PB: predicated region body
PF: predicated region fallthrough
CT: control target
= control target key end

     0   :  { %s1138_s0 = inlined_call_operand.hbm [shape: s32[16], index: 0, kind: input, shape index: {}]   ;;  %s1139_s1 = inlined_call_operand.hbm [shape: f32[256,128], index: 1, kind: input, shape index: {}]   ;;  %s1140_s2 = inlined_call_operand.hbm [shape: f32[16,128], index: 2, kind: output, shape index: {}]  }
   0x1   :  { %s425_s11 = scalar_lea.hbm %s1138_s0, 16 }
   0x2   :  { %p426_p0 = scmp.ne.s32.totalorder %s1138_s0, %s425_s11  ;;  %p429_p1 = scmp.lt.u32.totalorder %s425_s11, %s1138_s0 }
   0x4   :  { %p431_p2 = pnand %p429_p1, %p426_p0 }
   0x6   :  { %434 = shalt.err (!%p431_p2)  }
   0x7   :  { %s751_s16 = smov [#allocation4]  }
   0x8   :  { %8 = dma.hbm_to_smem %s1138_s0, 16, %s751_s16, [#allocation3] }
   0x9   :  { %701 = dma.done.wait [#allocation3], 16 }
   0xa   :  { %702 = vsyncadd [#allocation3], 4294967280 }
   0xb   :  { %10 = sfence }
   0xc   :  { %11 = vsyncpa [#allocation6], 0 }
   0xd   :  { %13 = vsyncpa [#allocation6 + $0x1], 0  ;;  %s780_s19 = smov 0   ;;  %s782_s20 = smov 0  }
   0xe   :  { %s784_s21 = smov 0  }
   0xf LB: > { %s331_s0 = sadd.s32 4294967295, %s749_s21   ;;  %s797_s22 = sadd.s32 1, %s749_s21   ;;  %s749_s21 = sphi %s784_s21, %s1153_s21   ;;  %s745_s20 = sphi %s782_s20, %s1152_s20   ;;  %s741_s19 = sphi %s780_s19, %s1151_s19  }
  0x10   : > { %s22_s23 = ssub.s32 %s749_s21, %s797_s22  ;;  %s25_s24 = sadd.s32 1, %s745_s20 }
  0x11   : > { %p23_p3 = scmp.eq.s32.totalorder %s22_s23, 0  ;;  %p332_p4 = scmp.ne.s32.totalorder %s22_s23, 0 }
  0x12   : > { %p29_p5 = scmp.eq.s32.totalorder %s749_s21, 1  ;;  %p34_p6 = scmp.ne.s32.totalorder %s745_s20, %s741_s19 }
  0x13   : > { %s806_s25 = scalar_select %p23_p3, %s745_s20, %s25_s24  }
  0x14   : > { %p808_p7 = por %p332_p4, %p29_p5  ;;  %p35_p8 = scmp.eq.s32.totalorder %s331_s0, 1 }
  0x15   : > { %p398_p9 = scmp.lt.s32.totalorder %s749_s21, 2  ;;  %s49_s28 = sand.u32 1, %s745_s20  }
  0x16   : > { %s1143_s26 = scalar_select %p808_p7, 1, 0 }
  0x17   : > { %p813_p10 = por %p35_p8, %p34_p6  ;;  %s334_s29 = sshll.u32 %s49_s28, 3 }
  0x18   : > { %s821_s30 = sshll.u32 %s749_s21, 3  ;;  %s829_s6 = scalar_lea.vmem [#allocation5], %s334_s29 }
  0x19   : > { %s1144_s27 = scalar_select %p813_p10, 1, 0 }
  0x1a   : > { %s67_s3 = sadd.s32 1, %s821_s30  ;;  %s63_s7 = sshll.u32 %s829_s6, 4  ;;  %s833_s7 = int_to_ptr.vmem [resolvable:$true] %s63_s7 }
  0x1b   : > { %s359_s4 = scalar_select %p398_p9, [#allocation4], [#allocation25] }
  0x1c   : > { %s360_s5 = scalar_select %p398_p9, %s821_s30, 0 }
  0x1d   : > { %s71_s8 = scalar_lea.vmem %s829_s6, 1 [#allocation5]  ;;  %s1155_s3 = smov (!%p398_p9, %s67_s3), 0 }
  0x1e   : > { %s53_s9 = sld [smem:[%s359_s4 + %s360_s5]]  ;;  %s80_s11 = sshll.u32 %s71_s8, 4  ;;  %s842_s11 = int_to_ptr.vmem [resolvable:$true] %s80_s11 }
  0x1f   : > { %s362_s10 = scalar_select %p398_p9, [#allocation4], [#allocation26] }
  0x20   : > { %s84_s12 = sadd.s32 2, %s821_s30  ;;  %s88_s16 = scalar_lea.vmem %s829_s6, 2 [#allocation5] }
  0x21   : > { %s840_s13 = sld [smem:[%s362_s10 + %s1155_s3]]  ;;  %s97_s23 = sshll.u32 %s88_s16, 4  ;;  %s886_s23 = int_to_ptr.vmem [resolvable:$true] %s97_s23 }
  0x22   : > { %s846_s14 = scalar_select %p398_p9, [#allocation4], [#allocation27] }
  0x23   : > { %s857_s4 = scalar_lea.hbm %s1139_s1, 4096 }
  0x24   : > { %s336_s15 = sshll.u32 %s53_s9, 4 }
  0x25   : > { %s55_s0 = scalar_lea.hbm %s1139_s1, %s336_s15 }
  0x26   : > { %s435_s24 = scalar_lea.hbm %s55_s0, 16  ;;  %p440_p0 = scmp.lt.u32.totalorder %s55_s0, %s1139_s1 }
  0x27   : > { %p436_p11 = scmp.ne.s32.totalorder %s55_s0, %s435_s24  ;;  %p441_p1 = scmp.lt.u32.totalorder %s857_s4, %s435_s24 }
  0x28   : > { %p443_p3 = scmp.lt.u32.totalorder %s435_s24, %s55_s0 }
  0x29   : > { %p437_p12 = pnand %p436_p11, %p398_p9  ;;  %p442_p2 = por %p441_p1, %p440_p0 }
  0x2b   : > { %p438_p13 = pneg %p437_p12  ;;  %p444_p4 = por %p443_p3, %p442_p2 }
  0x2d   : > { %p445_p5 = pnand %p444_p4, %p438_p13 }
  0x2f   : > { %448 = shalt.err (!%p445_p5)  }
  0x30   : > { %s449_s9 = scalar_lea.vmem %s833_s7, 16  ;;  %s752_s10 = smov [#allocation5]  }
  0x31   : > { %p450_p6 = scmp.ne.s32.totalorder %s833_s7, %s449_s9  ;;  %s453_s15 = sshll.u32 %s752_s10, 4  ;;  %s867_s15 = int_to_ptr.vmem [resolvable:$false] %s453_s15 }
  0x32   : > { %s870_s16 = scalar_lea.vmem %s867_s15, 256  ;;  %p1141_p12 = scmp.lt.s32.totalorder %s833_s7, %s867_s15 }
  0x33   : > { %p451_p8 = pnand %p450_p6, %p398_p9  ;;  %p457_p13 = scmp.lt.s32.totalorder %s870_s16, %s449_s9 }
  0x35   : > { %p452_p11 = pneg %p451_p8  ;;  %p458_p0 = por %p457_p13, %p1141_p12 }
  0x37   : > { %p459_p1 = pnand %p458_p0, %p452_p11 }
  0x39   : > { %462 = shalt.err (!%p459_p1)  }
  0x3a   : > { %361 = dma.hbm_to_vmem [thread:$0]  (%p398_p9), %s55_s0, 16, %s833_s7, [#allocation2] }
  0x3b   : > { %s1157_s12 = smov (!%p398_p9, %s84_s12), 0  ;;  %s337_s17 = sshll.u32 %s840_s13, 4 }
  0x3c   : > { %s70_s29 = scalar_lea.hbm %s1139_s1, %s337_s17  ;;  %s892_s3 = sld [smem:[%s846_s14 + %s1157_s12]] }
  0x3d   : > { %s463_s5 = scalar_lea.hbm %s70_s29, 16  ;;  %p468_p5 = scmp.lt.u32.totalorder %s70_s29, %s1139_s1 }
  0x3e   : > { %p464_p2 = scmp.ne.s32.totalorder %s70_s29, %s463_s5  ;;  %p469_p6 = scmp.lt.u32.totalorder %s857_s4, %s463_s5 }
  0x3f   : > { %p471_p11 = scmp.lt.u32.totalorder %s463_s5, %s70_s29 }
  0x40   : > { %p465_p3 = pnand %p464_p2, %p398_p9  ;;  %p470_p8 = por %p469_p6, %p468_p5 }
  0x42   : > { %p466_p4 = pneg %p465_p3  ;;  %p472_p13 = por %p471_p11, %p470_p8 }
  0x44   : > { %p473_p0 = pnand %p472_p13, %p466_p4 }
  0x46   : > { %476 = shalt.err (!%p473_p0)  }
  0x47   : > { %s477_s12 = scalar_lea.vmem %s842_s11, 16  ;;  %p484_p12 = scmp.lt.s32.totalorder %s842_s11, %s867_s15 }
  0x48   : > { %p478_p1 = scmp.ne.s32.totalorder %s842_s11, %s477_s12  ;;  %p485_p10 = scmp.lt.s32.totalorder %s870_s16, %s477_s12 }
  0x4a   : > { %p479_p2 = pnand %p478_p1, %p398_p9  ;;  %p486_p7 = por %p485_p10, %p484_p12 }
  0x4c   : > { %p480_p3 = pneg %p479_p2 }
  0x4e   : > { %p487_p5 = pnand %p486_p7, %p480_p3 }
  0x50   : > { %490 = shalt.err (!%p487_p5)  }
  0x51   : > { %364 = dma.hbm_to_vmem [thread:$0]  (%p398_p9), %s70_s29, 16, %s842_s11, [#allocation2 + $0x1] }
  0x52   : > { %s101_s13 = sadd.s32 3, %s821_s30  ;;  %s105_s14 = scalar_lea.vmem %s829_s6, 3 [#allocation5] }
  0x53   : > { %s368_s0 = scalar_select %p398_p9, [#allocation4], [#allocation28] }
  0x54   : > { %s1159_s13 = smov (!%p398_p9, %s101_s13), 0  ;;  %s114_s10 = sshll.u32 %s105_s14, 4  ;;  %s923_s10 = int_to_ptr.vmem [resolvable:$true] %s114_s10 }
  0x55   : > { %s118_s17 = sadd.s32 4, %s821_s30  ;;  %s338_s18 = sshll.u32 %s892_s3, 4 }
  0x56   : > { %s918_s24 = sld [smem:[%s368_s0 + %s1159_s13]]  ;;  %s87_s9 = scalar_lea.hbm %s1139_s1, %s338_s18 }
  0x57   : > { %s491_s12 = scalar_lea.hbm %s87_s9, 16  ;;  %p496_p4 = scmp.lt.u32.totalorder %s87_s9, %s1139_s1 }
  0x58   : > { %p492_p7 = scmp.ne.s32.totalorder %s87_s9, %s491_s12  ;;  %p497_p6 = scmp.lt.u32.totalorder %s857_s4, %s491_s12 }
  0x59   : > { %p499_p11 = scmp.lt.u32.totalorder %s491_s12, %s87_s9 }
  0x5a   : > { %p493_p10 = pnand %p492_p7, %p398_p9  ;;  %p498_p8 = por %p497_p6, %p496_p4 }
  0x5c   : > { %p494_p12 = pneg %p493_p10  ;;  %p500_p13 = por %p499_p11, %p498_p8 }
  0x5e   : > { %p501_p0 = pnand %p500_p13, %p494_p12 }
  0x60   : > { %504 = shalt.err (!%p501_p0)  }
  0x61   : > { %s505_s3 = scalar_lea.vmem %s886_s23, 16  ;;  %p512_p5 = scmp.lt.s32.totalorder %s886_s23, %s867_s15 }
  0x62   : > { %p506_p1 = scmp.ne.s32.totalorder %s886_s23, %s505_s3  ;;  %p513_p7 = scmp.lt.s32.totalorder %s870_s16, %s505_s3 }
  0x64   : > { %p507_p2 = pnand %p506_p1, %p398_p9  ;;  %p514_p10 = por %p513_p7, %p512_p5 }
  0x66   : > { %p508_p3 = pneg %p507_p2 }
  0x68   : > { %p515_p4 = pnand %p514_p10, %p508_p3 }
  0x6a   : > { %518 = shalt.err (!%p515_p4)  }
  0x6b   : > { %367 = dma.hbm_to_vmem [thread:$0]  (%p398_p9), %s87_s9, 16, %s886_s23, [#allocation2 + $0x2] }
  0x6c   : > { %s371_s13 = scalar_select %p398_p9, [#allocation4], [#allocation29] }
  0x6d   : > { %s1161_s17 = smov (!%p398_p9, %s118_s17), 0  ;;  %s122_s14 = scalar_lea.vmem %s829_s6, 4 [#allocation5] }
  0x6e   : > { %s135_s0 = sadd.s32 5, %s821_s30  ;;  %s339_s18 = sshll.u32 %s918_s24, 4 }
  0x6f   : > { %s948_s5 = sld [smem:[%s371_s13 + %s1161_s17]]  ;;  %s104_s11 = scalar_lea.hbm %s1139_s1, %s339_s18 }
  0x70   : > { %s131_s29 = sshll.u32 %s122_s14, 4  ;;  %s519_s3 = scalar_lea.hbm %s104_s11, 16  ;;  %s132_s29 = int_to_ptr.vmem [resolvable:$true] %s131_s29 }
  0x71   : > { %p520_p12 = scmp.ne.s32.totalorder %s104_s11, %s519_s3  ;;  %p524_p11 = scmp.lt.u32.totalorder %s104_s11, %s1139_s1 }
  0x72   : > { %p525_p13 = scmp.lt.u32.totalorder %s857_s4, %s519_s3  ;;  %p527_p1 = scmp.lt.u32.totalorder %s519_s3, %s104_s11 }
  0x73   : > { %p521_p6 = pnand %p520_p12, %p398_p9 }
  0x74   : > { %p526_p0 = por %p525_p13, %p524_p11 }
  0x75   : > { %p522_p8 = pneg %p521_p6 }
  0x76   : > { %p528_p2 = por %p527_p1, %p526_p0 }
  0x78   : > { %p529_p3 = pnand %p528_p2, %p522_p8 }
  0x7a   : > { %532 = shalt.err (!%p529_p3)  }
  0x7b   : > { %s533_s17 = scalar_lea.vmem %s923_s10, 16  ;;  %p540_p4 = scmp.lt.s32.totalorder %s923_s10, %s867_s15 }
  0x7c   : > { %p534_p5 = scmp.ne.s32.totalorder %s923_s10, %s533_s17  ;;  %p541_p12 = scmp.lt.s32.totalorder %s870_s16, %s533_s17 }
  0x7e   : > { %p535_p7 = pnand %p534_p5, %p398_p9  ;;  %p542_p6 = por %p541_p12, %p540_p4 }
  0x80   : > { %p536_p10 = pneg %p535_p7 }
  0x82   : > { %p543_p11 = pnand %p542_p6, %p536_p10 }
  0x84   : > { %546 = shalt.err (!%p543_p11)  }
  0x85   : > { %370 = dma.hbm_to_vmem [thread:$0]  (%p398_p9), %s104_s11, 16, %s923_s10, [#allocation2 + $0x3] }
  0x86   : > { %s139_s24 = scalar_lea.vmem %s829_s6, 5 [#allocation5]  ;;  %s1163_s0 = smov (!%p398_p9, %s135_s0), 0 }
  0x87   : > { %s374_s13 = scalar_select %p398_p9, [#allocation4], [#allocation30] }
  0x88   : > { %s340_s14 = sshll.u32 %s948_s5, 4  ;;  %s148_s18 = sshll.u32 %s139_s24, 4  ;;  %s992_s18 = int_to_ptr.vmem [resolvable:$true] %s148_s18 }
  0x89   : > { %s121_s3 = scalar_lea.hbm %s1139_s1, %s340_s14  ;;  %s978_s23 = sld [smem:[%s374_s13 + %s1163_s0]] }
  0x8a   : > { %s547_s9 = scalar_lea.hbm %s121_s3, 16  ;;  %p552_p1 = scmp.lt.u32.totalorder %s121_s3, %s1139_s1 }
  0x8b   : > { %p548_p8 = scmp.ne.s32.totalorder %s121_s3, %s547_s9  ;;  %p553_p2 = scmp.lt.u32.totalorder %s857_s4, %s547_s9 }
  0x8c   : > { %p555_p5 = scmp.lt.u32.totalorder %s547_s9, %s121_s3 }
  0x8d   : > { %p549_p13 = pnand %p548_p8, %p398_p9  ;;  %p554_p3 = por %p553_p2, %p552_p1 }
  0x8f   : > { %p550_p0 = pneg %p549_p13  ;;  %p556_p7 = por %p555_p5, %p554_p3 }
  0x91   : > { %p557_p10 = pnand %p556_p7, %p550_p0 }
  0x93   : > { %560 = shalt.err (!%p557_p10)  }
  0x94   : > { %s561_s5 = scalar_lea.vmem %s132_s29, 16  ;;  %p568_p11 = scmp.lt.s32.totalorder %s132_s29, %s867_s15 }
  0x95   : > { %p562_p4 = scmp.ne.s32.totalorder %s132_s29, %s561_s5  ;;  %p569_p8 = scmp.lt.s32.totalorder %s870_s16, %s561_s5 }
  0x97   : > { %p563_p12 = pnand %p562_p4, %p398_p9  ;;  %p570_p13 = por %p569_p8, %p568_p11 }
  0x99   : > { %p564_p6 = pneg %p563_p12 }
  0x9b   : > { %p571_p1 = pnand %p570_p13, %p564_p6 }
  0x9d   : > { %574 = shalt.err (!%p571_p1)  }
  0x9e   : > { %373 = dma.hbm_to_vmem [thread:$0]  (%p398_p9), %s121_s3, 16, %s132_s29, [#allocation2 + $0x4] }
  0x9f   : > { %s152_s0 = sadd.s32 6, %s821_s30  ;;  %s156_s24 = scalar_lea.vmem %s829_s6, 6 [#allocation5] }
  0xa0   : > { %s377_s17 = scalar_select %p398_p9, [#allocation4], [#allocation31] }
  0xa1   : > { %s1165_s0 = smov (!%p398_p9, %s152_s0), 0  ;;  %s169_s13 = sadd.s32 7, %s821_s30 }
  0xa2   : > { %s341_s14 = sshll.u32 %s978_s23, 4  ;;  %s1002_s8 = sld [smem:[%s377_s17 + %s1165_s0]] }
  0xa3   : > { %s138_s10 = scalar_lea.hbm %s1139_s1, %s341_s14  ;;  %s165_s11 = sshll.u32 %s156_s24, 4  ;;  %s166_s11 = int_to_ptr.vmem [resolvable:$true] %s165_s11 }
  0xa4   : > { %s575_s5 = scalar_lea.hbm %s138_s10, 16  ;;  %p580_p5 = scmp.lt.u32.totalorder %s138_s10, %s1139_s1 }
  0xa5   : > { %p576_p0 = scmp.ne.s32.totalorder %s138_s10, %s575_s5  ;;  %p581_p7 = scmp.lt.u32.totalorder %s857_s4, %s575_s5 }
  0xa6   : > { %p583_p4 = scmp.lt.u32.totalorder %s575_s5, %s138_s10 }
  0xa7   : > { %p577_p2 = pnand %p576_p0, %p398_p9  ;;  %p582_p10 = por %p581_p7, %p580_p5 }
  0xa9   : > { %p578_p3 = pneg %p577_p2  ;;  %p584_p12 = por %p583_p4, %p582_p10 }
  0xab   : > { %p585_p6 = pnand %p584_p12, %p578_p3 }
  0xad   : > { %588 = shalt.err (!%p585_p6)  }
  0xae   : > { %s589_s30 = scalar_lea.vmem %s992_s18, 16  ;;  %p596_p1 = scmp.lt.s32.totalorder %s992_s18, %s867_s15 }
  0xaf   : > { %p590_p11 = scmp.ne.s32.totalorder %s992_s18, %s589_s30  ;;  %p597_p0 = scmp.lt.s32.totalorder %s870_s16, %s589_s30 }
  0xb1   : > { %p591_p8 = pnand %p590_p11, %p398_p9  ;;  %p598_p2 = por %p597_p0, %p596_p1 }
  0xb3   : > { %p592_p13 = pneg %p591_p8 }
  0xb5   : > { %p599_p5 = pnand %p598_p2, %p592_p13 }
  0xb7   : > { %602 = shalt.err (!%p599_p5)  }
  0xb8   : > { %376 = dma.hbm_to_vmem [thread:$0]  (%p398_p9), %s138_s10, 16, %s992_s18, [#allocation2 + $0x5] }
  0xb9   : > { %s380_s23 = scalar_select %p398_p9, [#allocation4], [#allocation32] }
  0xba   : > { %s1167_s13 = smov (!%p398_p9, %s169_s13), 0  ;;  %s342_s0 = sshll.u32 %s1002_s8, 4 }
  0xbb   : > { %s173_s17 = scalar_lea.vmem %s829_s6, 7 [#allocation5]  ;;  %s155_s12 = scalar_lea.hbm %s1139_s1, %s342_s0 }
  0xbc   : > { %s170_s9 = sld [smem:[%s380_s23 + %s1167_s13]]  ;;  %s603_s5 = scalar_lea.hbm %s155_s12, 16 }
  0xbd   : > { %p604_p3 = scmp.ne.s32.totalorder %s155_s12, %s603_s5  ;;  %p608_p4 = scmp.lt.u32.totalorder %s155_s12, %s1139_s1 }
  0xbe   : > { %p609_p12 = scmp.lt.u32.totalorder %s857_s4, %s603_s5  ;;  %p611_p11 = scmp.lt.u32.totalorder %s603_s5, %s155_s12 }
  0xbf   : > { %p605_p7 = pnand %p604_p3, %p398_p9 }
  0xc0   : > { %p610_p6 = por %p609_p12, %p608_p4 }
  0xc1   : > { %p606_p10 = pneg %p605_p7 }
  0xc2   : > { %p612_p8 = por %p611_p11, %p610_p6 }
  0xc4   : > { %p613_p13 = pnand %p612_p8, %p606_p10 }
  0xc6   : > { %616 = shalt.err (!%p613_p13)  }
  0xc7   : > { %s617_s6 = scalar_lea.vmem %s166_s11, 16  ;;  %p624_p5 = scmp.lt.s32.totalorder %s166_s11, %s867_s15 }
  0xc8   : > { %p618_p1 = scmp.ne.s32.totalorder %s166_s11, %s617_s6  ;;  %p625_p3 = scmp.lt.s32.totalorder %s870_s16, %s617_s6 }
  0xca   : > { %p619_p0 = pnand %p618_p1, %p398_p9  ;;  %p626_p7 = por %p625_p3, %p624_p5 }
  0xcc   : > { %p620_p2 = pneg %p619_p0 }
  0xce   : > { %p627_p4 = pnand %p626_p7, %p620_p2 }
  0xd0   : > { %630 = shalt.err (!%p627_p4)  }
  0xd1   : > { %379 = dma.hbm_to_vmem [thread:$0]  (%p398_p9), %s155_s12, 16, %s166_s11, [#allocation2 + $0x6] }
  0xd2   : > { %s182_s18 = sshll.u32 %s173_s17, 4  ;;  %s343_s13 = sshll.u32 %s170_s9, 4  ;;  %s183_s18 = int_to_ptr.vmem [resolvable:$true] %s182_s18 }
  0xd3   : > { %s172_s30 = scalar_lea.hbm %s1139_s1, %s343_s13 }
  0xd4   : > { %s631_s23 = scalar_lea.hbm %s172_s30, 16  ;;  %p636_p11 = scmp.lt.u32.totalorder %s172_s30, %s1139_s1 }
  0xd5   : > { %p632_p10 = scmp.ne.s32.totalorder %s172_s30, %s631_s23  ;;  %p637_p8 = scmp.lt.u32.totalorder %s857_s4, %s631_s23 }
  0xd6   : > { %p639_p1 = scmp.lt.u32.totalorder %s631_s23, %s172_s30 }
  0xd7   : > { %p633_p12 = pnand %p632_p10, %p398_p9  ;;  %p638_p13 = por %p637_p8, %p636_p11 }
  0xd9   : > { %p634_p6 = pneg %p633_p12  ;;  %p640_p0 = por %p639_p1, %p638_p13 }
  0xdb   : > { %p641_p2 = pnand %p640_p0, %p634_p6 }
  0xdd   : > { %644 = shalt.err (!%p641_p2)  }
  0xde   : > { %s645_s11 = scalar_lea.vmem %s183_s18, 16  ;;  %p652_p4 = scmp.lt.s32.totalorder %s183_s18, %s867_s15 }
  0xdf   : > { %p646_p5 = scmp.ne.s32.totalorder %s183_s18, %s645_s11  ;;  %p653_p10 = scmp.lt.s32.totalorder %s870_s16, %s645_s11 }
  0xe1   : > { %p647_p3 = pnand %p646_p5, %p398_p9  ;;  %p654_p12 = por %p653_p10, %p652_p4 }
  0xe3   : > { %p648_p7 = pneg %p647_p3 }
  0xe5   : > { %p655_p8 = pnand %p654_p12, %p648_p7 }
  0xe7   : > { %658 = shalt.err (!%p655_p8)  }
  0xe8   : > { %382 = dma.hbm_to_vmem [thread:$0]  (%p398_p9), %s172_s30, 16, %s183_s18, [#allocation2 + $0x7] }
  0xe9   : > { %704 = dma.done.wait (%p398_p9), [#allocation2], 16 }
  0xea   : > { %706 = vsyncadd (%p398_p9), [#allocation2], 4294967280 }
  0xeb   : > { %708 = dma.done.wait (%p398_p9), [#allocation2 + $0x1], 16 }
  0xec   : > { %710 = vsyncadd (%p398_p9), [#allocation2 + $0x1], 4294967280 }
  0xed   : > { %712 = dma.done.wait (%p398_p9), [#allocation2 + $0x2], 16 }
  0xee   : > { %714 = vsyncadd (%p398_p9), [#allocation2 + $0x2], 4294967280 }
  0xef   : > { %716 = dma.done.wait (%p398_p9), [#allocation2 + $0x3], 16 }
  0xf0   : > { %718 = vsyncadd (%p398_p9), [#allocation2 + $0x3], 4294967280 }
  0xf1   : > { %720 = dma.done.wait (%p398_p9), [#allocation2 + $0x4], 16 }
  0xf2   : > { %722 = vsyncadd (%p398_p9), [#allocation2 + $0x4], 4294967280 }
  0xf3   : > { %724 = dma.done.wait (%p398_p9), [#allocation2 + $0x5], 16 }
  0xf4   : > { %726 = vsyncadd (%p398_p9), [#allocation2 + $0x5], 4294967280 }
  0xf5   : > { %728 = dma.done.wait (%p398_p9), [#allocation2 + $0x6], 16 }
  0xf6   : > { %730 = vsyncadd (%p398_p9), [#allocation2 + $0x6], 4294967280 }
  0xf7   : > { %732 = dma.done.wait (%p398_p9), [#allocation2 + $0x7], 16 }
  0xf8   : > { %734 = vsyncadd (%p398_p9), [#allocation2 + $0x7], 4294967280  ;;  %s345_s4 = sshll.u32 %s749_s21, 7  ;;  %p1145_p6 = scmp.ne.s32.totalorder %s1143_s26, 0 }
  0xf9   : > { %s215_s12 = scalar_lea.hbm %s1140_s2, %s345_s4  ;;  %s229_s5 = sand.u32 1, %s741_s19  }
  0xfa   : > { %p1099_p11 = pnand %p398_p9, %p1145_p6  ;;  %s204_s29 = scalar_lea.sflag [#allocation6], %s49_s28 }
  0xfb   : > { %s659_s3 = scalar_lea.vmem %s833_s7, 128  ;;  %p1147_p7 = scmp.lt.s32.totalorder %s833_s7, %s867_s15 }
  0xfc   : > { %s1146_s9 = scalar_select %p1099_p11, 1, 0 }
  0xfd   : > { %p660_p1 = scmp.ne.s32.totalorder %s833_s7, %s659_s3  ;;  %p661_p0 = pneg %p1099_p11 }
  0xfe   : > { %p668_p3 = scmp.lt.s32.totalorder %s870_s16, %s659_s3 }
  0xff   : > { %p662_p2 = pnand %p661_p0, %p660_p1 }
 0x100   : > { %p669_p4 = por %p668_p3, %p1147_p7 }
 0x101   : > { %p663_p5 = pneg %p662_p2 }
 0x103   : > { %p670_p10 = pnand %p669_p4, %p663_p5 }
 0x105   : > { %673 = shalt.err (!%p670_p10)
}
 0x106   : > { %s674_s26 = scalar_lea.hbm %s215_s12, 128  ;;  %s679_s19 = scalar_lea.hbm %s1140_s2, 256 }
 0x107   : > { %p675_p9 = scmp.ne.s32.totalorder %s215_s12, %s674_s26  ;;  %p680_p6 = scmp.lt.u32.totalorder %s215_s12, %s1140_s2 }
 0x108   : > { %p681_p13 = scmp.lt.u32.totalorder %s679_s19, %s674_s26  ;;  %p683_p2 = scmp.lt.u32.totalorder %s674_s26, %s215_s12 }
 0x109   : > { %p677_p12 = pnand %p675_p9, %p661_p0 }
 0x10a   : > { %p682_p1 = por %p681_p13, %p680_p6 }
 0x10b   : > { %p678_p8 = pneg %p677_p12 }
 0x10c   : > { %p684_p11 = por %p683_p2, %p682_p1 }
 0x10e   : > { %p685_p3 = pnand %p684_p11, %p678_p8 }
 0x110   : > { %688 = shalt.err (!%p685_p3)
}
 0x111   : > { %p1148_p5 = scmp.ne.s32.totalorder %s1146_s9, 0  ;;  %p1149_p0 = scmp.ne.s32.totalorder %s1144_s27, 0 }
 0x112   : > { %p1150_p7 = scmp.ge.s32.totalorder %s749_s21, 1  ;;  %s230_s15 = scalar_lea.sflag [#allocation6], %s229_s5 }
 0x113   : > { %393 = dma.vmem_to_hbm [thread:$0]  (!%p1148_p5), %s833_s7, 128, %s215_s12, %s204_s29  }
 0x114   : > { %p395_p4 = pnand %p1150_p7, %p1149_p0 }
 0x116   : > { %736 = dma.done.wait (!%p395_p4), %s230_s15, 128  }
 0x117   : > { %738 = vsyncadd (!%p395_p4), %s230_s15, 4294967168  ;;  %p16_p13 = scmp.ge.s32.totalorder %s797_s22, 3   ;;  %s1151_s19 = smov %s745_s20 }
 0x118   : > { %s1152_s20 = smov %s806_s25  ;;  %s1153_s21 = smov %s797_s22 }
 0x119   :  { %18 = sbr.rel (!%p16_p13) target bundleno = 15 (0xf), region = 105 }
 0x120   :  { %235 = vsyncpa [#allocation6], 1 }
 0x121   :  { %237 = vsyncpa [#allocation6 + $0x1], 1 }
 0x122   :  { %238 = vsyncmov [#allocation2] }
 0x125   :  { %s239_s21 = vpop.sfrf %238 }
 0x126   :  { %p348_p11 = scmp.ne.s32.totalorder %s239_s21, 0 }
 0x128   :  { %243 = shalt.err (%p348_p11)  }
 0x129   :  { %245 = vsyncmov [#allocation2 + $0x1] }
 0x12c   :  { %s246_s27 = vpop.sfrf %245 }
 0x12d   :  { %p349_p10 = scmp.ne.s32.totalorder %s246_s27, 0 }
 0x12f   :  { %250 = shalt.err (%p349_p10)  }
 0x130   :  { %252 = vsyncmov [#allocation2 + $0x2] }
 0x133   :  { %s253_s7 = vpop.sfrf %252 }
 0x134   :  { %p350_p9 = scmp.ne.s32.totalorder %s253_s7, 0 }
 0x136   :  { %257 = shalt.err (%p350_p9)  }
 0x137   :  { %259 = vsyncmov [#allocation2 + $0x3] }
 0x13a   :  { %s260_s16 = vpop.sfrf %259 }
 0x13b   :  { %p351_p12 = scmp.ne.s32.totalorder %s260_s16, 0 }
 0x13d   :  { %264 = shalt.err (%p351_p12)  }
 0x13e   :  { %266 = vsyncmov [#allocation2 + $0x4] }
 0x141   :  { %s267_s22 = vpop.sfrf %266 }
 0x142   :  { %p352_p8 = scmp.ne.s32.totalorder %s267_s22, 0 }
 0x144   :  { %271 = shalt.err (%p352_p8)  }
 0x145   :  { %273 = vsyncmov [#allocation2 + $0x5] }
 0x148   :  { %s274_s1 = vpop.sfrf %273 }
 0x149   :  { %p353_p6 = scmp.ne.s32.totalorder %s274_s1, 0 }
 0x14b   :  { %278 = shalt.err (%p353_p6)  }
 0x14c   :  { %280 = vsyncmov [#allocation2 + $0x6] }
 0x14f   :  { %s281_s2 = vpop.sfrf %280 }
 0x150   :  { %p354_p1 = scmp.ne.s32.totalorder %s281_s2, 0 }
 0x152   :  { %285 = shalt.err (%p354_p1)  }
 0x153   :  { %287 = vsyncmov [#allocation2 + $0x7] }
 0x156   :  { %s288_s20 = vpop.sfrf %287 }
 0x157   :  { %p355_p2 = scmp.ne.s32.totalorder %s288_s20, 0 }
 0x159   :  { %292 = shalt.err (%p355_p2)  }

</bundles_post_ra>
